<compile_context>
chip_gen: v7x
topology: tpu7x:2x2x1
jax: 0.10.0
libtpu: 0.0.40
codegen_flags: <defaults>
</compile_context>

<pallas_src>
import jax
import jax.numpy as jnp
from jax.experimental import pallas as pl
from jax.experimental.pallas import tpu as pltpu


def _packed_ce_kernel(logits_ref, targets_ref, out_ref, acc_ref):
    """One (row_tile, V) tile: masked cross-entropy accumulated into VMEM scratch."""
    j = pl.program_id(1)  # inner ("arbitrary") row-tile axis of the current chunk

    @pl.when(j == 0)
    def _init():
        acc_ref[...] = jnp.zeros_like(acc_ref)

    x = logits_ref[...].astype(jnp.float32)                  # (rt, V) — cast in-kernel
    # numerically-stable log-sum-exp per row
    m = jnp.max(x, axis=-1, keepdims=True)                   # (rt, 1)
    lse = m + jnp.log(jnp.sum(jnp.exp(x - m), axis=-1, keepdims=True))

    # gather the target logit with an iota==target select (no dynamic gather on TPU)
    col = jax.lax.broadcasted_iota(jnp.int32, x.shape, 1)    # (rt, V)
    tgt = targets_ref[...]                                   # (rt, 1) int32; -1 == invalid row
    tgt_logit = jnp.sum(jnp.where(col == tgt, x, 0.0), axis=-1, keepdims=True)

    valid = tgt >= 0                                         # padded rows contribute 0
    acc_ref[...] += jnp.where(valid, lse - tgt_logit, 0.0)   # cheap VPU add, no per-step reduce

    @pl.when(j == pl.num_programs(1) - 1)
    def _finalize():
        out_ref[...] = jnp.sum(acc_ref[...], axis=0, keepdims=True)   # (1, 1) partial sum


def packed_cross_entropy_loss(predictions, targets, lengths):
    """JAX/Pallas equivalent of PackedCrossEntropyLoss.forward.

    predictions: (B, T, V) float (any float dtype), batch_first, sorted by length desc.
    targets:     (B, T) integer class ids.
    lengths:     (B,) integer valid lengths (>= 1, as pack_padded_sequence requires).
    """
    B, T, V = predictions.shape
    N = B * T
    itemsize = jnp.dtype(predictions.dtype).itemsize

    # --- row-tile sizing: largest tile whose double-buffered logits blocks stay ~8 MiB
    #     (safe against v7x's smaller VMEM; explicitly capped scoped VMEM below). ---
    align = 16 if itemsize < 4 else 8
    rt = (8 * 1024 * 1024) // (2 * V * itemsize)
    rt = max(align, (rt // align) * align)
    rt = min(rt, 1024)
    rt = min(rt, ((N + align - 1) // align) * align)          # don't exceed the data

    n_tiles = -(-N // rt)
    num_chunks = 2 if n_tiles >= 2 else 1                     # leading "parallel" axis (megacore)
    tiles_per_chunk = -(-n_tiles // num_chunks)
    n_tiles_pad = num_chunks * tiles_per_chunk
    n_pad = n_tiles_pad * rt

    # Stream logits in their native dtype; never upcast in the wrapper.
    logits = predictions.reshape(N, V)
    # Fold the validity mask into the targets: invalid positions get -1.
    mask = jnp.arange(T, dtype=jnp.int32)[None, :] < lengths.astype(jnp.int32)[:, None]
    tgt = jnp.where(mask, targets.astype(jnp.int32), -1).reshape(N, 1)
    if n_pad > N:
        logits = jnp.pad(logits, ((0, n_pad - N), (0, 0)))            # finite zeros
        tgt = jnp.pad(tgt, ((0, n_pad - N), (0, 0)), constant_values=-1)

    partial = pl.pallas_call(
        _packed_ce_kernel,
        out_shape=jax.ShapeDtypeStruct((num_chunks, 1), jnp.float32),
        grid_spec=pltpu.PrefetchScalarGridSpec(
            num_scalar_prefetch=0,
            grid=(num_chunks, tiles_per_chunk),
            in_specs=[
                pl.BlockSpec((rt, V), lambda c, j: (c * tiles_per_chunk + j, 0)),
                pl.BlockSpec((rt, 1), lambda c, j: (c * tiles_per_chunk + j, 0)),
            ],
            out_specs=pl.BlockSpec((1, 1), lambda c, j: (c, 0)),
            scratch_shapes=[pltpu.VMEM((rt, 1), jnp.float32)],
        ),
        compiler_params=pltpu.CompilerParams(
            dimension_semantics=("parallel", "arbitrary"),
            vmem_limit_bytes=32 * 1024 * 1024,
        ),
    )(logits, tgt)

    # Denominator == number of packed tokens == sum(lengths).  pack_padded_sequence
    # requires all lengths >= 1, so this is never zero for valid inputs (matching torch).
    denom = jnp.sum(lengths).astype(jnp.float32)
    return jnp.sum(partial) / denom


def _reference_loss(predictions, targets, lengths):
    """Pure-JAX reference: masked mean cross-entropy (== packed CE loss)."""
    B, T, V = predictions.shape
    logp = jax.nn.log_softmax(predictions.astype(jnp.float32), axis=-1)
    tgt_logp = jnp.take_along_axis(logp, targets[..., None].astype(jnp.int32), axis=-1)[..., 0]
    mask = (jnp.arange(T)[None, :] < lengths[:, None]).astype(jnp.float32)
    return -(tgt_logp * mask).sum() / mask.sum()


if __name__ == "__main__":
    # small shapes consistent with the module: B=2 captions, T=8 max length, V=128 vocab
    B, T, V = 2, 8, 128
    key = jax.random.PRNGKey(0)
    k_pred, k_tgt = jax.random.split(key)

    predictions = jax.random.normal(k_pred, (B, T, V), dtype=jnp.float32)
    targets = jax.random.randint(k_tgt, (B, T), 0, V, dtype=jnp.int32)
    # lengths sorted descending, as pack_padded_sequence(enforce_sorted=True) requires
    lengths = jnp.array([8, 5], dtype=jnp.int32)

    loss = packed_cross_entropy_loss(predictions, targets, lengths)
    loss = jax.block_until_ready(loss)

    ref = _reference_loss(predictions, targets, lengths)
    assert jnp.allclose(loss, ref, atol=1e-5, rtol=1e-5), (loss, ref)

    print("KERNEL_OK")
</pallas_src>

<mosaic_0001>
module attributes {stable_mosaic.version = 11 : i64} {
  func.func @_packed_ce_kernel(%arg0: i32, %arg1: i32, %arg2: memref<16x128xf32, #tpu.memory_space<vmem>>, %arg3: memref<16x1xi32, #tpu.memory_space<vmem>>, %arg4: memref<1x1xf32, #tpu.memory_space<vmem>>, %arg5: memref<16x1xf32, #tpu.memory_space<vmem>>) attributes {dimension_semantics = [#tpu.dimension_semantics<parallel>, #tpu.dimension_semantics<arbitrary>], iteration_bounds = array<i64: 1, 1>, scalar_prefetch = 0 : i64, scratch_operands = 1 : i64, tpu.core_type = #tpu.core_type<tc>, window_params = [{transform_indices = @transform_0, window_bounds = array<i64: 16, 128>}, {transform_indices = @transform_1, window_bounds = array<i64: 16, 1>}, {transform_indices = @transform_2, window_bounds = array<i64: 1, 1>}]} {
    %c0_i32 = arith.constant 0 : i32
    %0 = arith.cmpi eq, %arg1, %c0_i32 : i32
    %1 = arith.extui %0 : i1 to i32
    %c0_i32_0 = arith.constant 0 : i32
    %2 = arith.cmpi ne, %1, %c0_i32_0 : i32
    scf.if %2 {
      %cst_15 = arith.constant 0.000000e+00 : f32
      %32 = vector.broadcast %cst_15 : f32 to vector<16x1xf32>
      %c0_16 = arith.constant 0 : index
      %c0_17 = arith.constant 0 : index
      %33 = vector.load %arg5[%c0_16, %c0_17] : memref<16x1xf32, #tpu.memory_space<vmem>>, vector<16x1xf32>
      tpu.vector_store %arg5[%c0_16, %c0_17], %32 {strides = array<i32>} : memref<16x1xf32, #tpu.memory_space<vmem>>, vector<16x1xf32>,
    } else {
    }
    %c0 = arith.constant 0 : index
    %c0_1 = arith.constant 0 : index
    %3 = vector.load %arg2[%c0, %c0_1] : memref<16x128xf32, #tpu.memory_space<vmem>>, vector<16x128xf32>
    %cst = arith.constant dense<0xFF800000> : vector<16xf32>
    %4 = vector.multi_reduction <maximumf>, %3, %cst [1] : vector<16x128xf32> to vector<16xf32>
    %5 = vector.shape_cast %4 : vector<16xf32> to vector<16x1xf32>
    %6 = vector.broadcast %5 : vector<16x1xf32> to vector<16x128xf32>
    %7 = arith.subf %3, %6 : vector<16x128xf32>
    %8 = math.exp %7 : vector<16x128xf32>
    %cst_2 = arith.constant dense<0.000000e+00> : vector<16xf32>
    %9 = vector.multi_reduction <add>, %8, %cst_2 [1] : vector<16x128xf32> to vector<16xf32>
    %10 = vector.shape_cast %9 : vector<16xf32> to vector<16x1xf32>
    %11 = math.log %10 : vector<16x1xf32>
    %12 = arith.addf %5, %11 : vector<16x1xf32>
    %13 = tpu.iota {dimensions = array<i32: 1>} : vector<16x128xi32>
    %c0_3 = arith.constant 0 : index
    %c0_4 = arith.constant 0 : index
    %14 = vector.load %arg3[%c0_3, %c0_4] : memref<16x1xi32, #tpu.memory_space<vmem>>, vector<16x1xi32>
    %15 = vector.broadcast %14 : vector<16x1xi32> to vector<16x128xi32>
    %16 = arith.cmpi eq, %13, %15 : vector<16x128xi32>
    %cst_5 = arith.constant 0.000000e+00 : f32
    %17 = vector.broadcast %cst_5 : f32 to vector<16x128xf32>
    %18 = arith.select %16, %3, %17 : vector<16x128xi1>, vector<16x128xf32>
    %cst_6 = arith.constant dense<0.000000e+00> : vector<16xf32>
    %19 = vector.multi_reduction <add>, %18, %cst_6 [1] : vector<16x128xf32> to vector<16xf32>
    %20 = vector.shape_cast %19 : vector<16xf32> to vector<16x1xf32>
    %c0_i32_7 = arith.constant 0 : i32
    %21 = vector.broadcast %c0_i32_7 : i32 to vector<16x1xi32>
    %22 = arith.cmpi sge, %14, %21 : vector<16x1xi32>
    %c0_8 = arith.constant 0 : index
    %c0_9 = arith.constant 0 : index
    %23 = vector.load %arg5[%c0_8, %c0_9] : memref<16x1xf32, #tpu.memory_space<vmem>>, vector<16x1xf32>
    %24 = arith.subf %12, %20 : vector<16x1xf32>
    %cst_10 = arith.constant 0.000000e+00 : f32
    %25 = vector.broadcast %cst_10 : f32 to vector<16x1xf32>
    %26 = arith.select %22, %24, %25 : vector<16x1xi1>, vector<16x1xf32>
    %27 = arith.addf %23, %26 : vector<16x1xf32>
    %c0_11 = arith.constant 0 : index
    %c0_12 = arith.constant 0 : index
    %28 = vector.load %arg5[%c0_11, %c0_12] : memref<16x1xf32, #tpu.memory_space<vmem>>, vector<16x1xf32>
    tpu.vector_store %arg5[%c0_11, %c0_12], %27 {strides = array<i32>} : memref<16x1xf32, #tpu.memory_space<vmem>>, vector<16x1xf32>,
    %c0_i32_13 = arith.constant 0 : i32
    %29 = arith.cmpi eq, %arg1, %c0_i32_13 : i32
    %30 = arith.extui %29 : i1 to i32
    %c0_i32_14 = arith.constant 0 : i32
    %31 = arith.cmpi ne, %30, %c0_i32_14 : i32
    scf.if %31 {
      %c0_15 = arith.constant 0 : index
      %c0_16 = arith.constant 0 : index
      %32 = vector.load %arg5[%c0_15, %c0_16] : memref<16x1xf32, #tpu.memory_space<vmem>>, vector<16x1xf32>
      %cst_17 = arith.constant dense<0.000000e+00> : vector<1xf32>
      %33 = vector.multi_reduction <add>, %32, %cst_17 [0] : vector<16x1xf32> to vector<1xf32>
      %34 = vector.shape_cast %33 : vector<1xf32> to vector<1x1xf32>
      %c0_18 = arith.constant 0 : index
      %c0_19 = arith.constant 0 : index
      %35 = vector.load %arg4[%c0_18, %c0_19] : memref<1x1xf32, #tpu.memory_space<vmem>>, vector<1x1xf32>
      tpu.vector_store %arg4[%c0_18, %c0_19], %34 {strides = array<i32>} : memref<1x1xf32, #tpu.memory_space<vmem>>, vector<1x1xf32>,
    } else {
    }
    return
  }
  func.func @transform_0(%arg0: i32, %arg1: i32) -> (i32, i32) {
    %c1_i32 = arith.constant 1 : i32
    %0 = arith.muli %arg0, %c1_i32 : i32
    %1 = arith.addi %0, %arg1 : i32
    %c0_i32 = arith.constant 0 : i32
    %c0_i32_0 = arith.constant 0 : i32
    return %1, %c0_i32 : i32, i32
  }
  func.func @transform_1(%arg0: i32, %arg1: i32) -> (i32, i32) {
    %c1_i32 = arith.constant 1 : i32
    %0 = arith.muli %arg0, %c1_i32 : i32
    %1 = arith.addi %0, %arg1 : i32
    %c0_i32 = arith.constant 0 : i32
    %c0_i32_0 = arith.constant 0 : i32
    return %1, %c0_i32 : i32, i32
  }
  func.func @transform_2(%arg0: i32, %arg1: i32) -> (i32, i32) {
    %c0_i32 = arith.constant 0 : i32
    %c0_i32_0 = arith.constant 0 : i32
    return %arg0, %c0_i32 : i32, i32
  }
}

</mosaic_0001>

<bundles_post_ra>
// kernel: tpu_custom_call.1
= control target key start
LH: loop header
LB: loop body
LE: loop exit
PB: predicated region body
PF: predicated region fallthrough
CT: control target
= control target key end

     0   :  { %v195_v2 = vmov 0   ;;  %s243_s0 = inlined_call_operand.vmem [shape: f32[16,128], index: 0, kind: input, shape index: {}]   ;;  %s244_s1 = inlined_call_operand.vmem [shape: s32[16,1], index: 1, kind: input, shape index: {}]   ;;  %s245_s2 = inlined_call_operand.hbm [shape: f32[1,1], index: 2, kind: output, shape index: {}]  }
   0x1   :  { %v63_v0 = vld [vmem:[%s243_s0] sm:$0xff]  ;;  %161 = vset.pattern.permute.xlu1 %v195_v2 }
   0x2   :  { %v87_v1 = vld [vmem:[%s244_s1] sm:$0xff]  ;;  %65 = vmax.xlane.f32.xlu0 %v63_v0 }
   0x3   :  { %7 = vsyncpa [#allocation4], 0  ;;  %v64_v3 = vld [vmem:[%s243_s0 + $0x8] sm:$0xff]  ;;  %90 = vperm.xlu1 %161, %v87_v1   ;;  %162 = vset.pattern.permute.xlu0 %v195_v2  ;;  %v85_v10 = vlaneseq  ;;  %vm60_vm2 = vcmask 7168   ;;  %v196_v19 = vmov 0.0   ;;  %vm103_vm3 = vcmp.ge.s32.totalorder %v87_v1, 0 }
   0x4   :  { %v88_v4 = vld [vmem:[%s244_s1 + $0x8] sm:$0xff]  ;;  %61 = vst.msk [vmem:[#allocation2] sm:$0xff] %vm60_vm2, %v196_v19  ;;  %62 = vst.msk [vmem:[#allocation2 + $0x8] sm:$0xff] %vm60_vm2, %v196_v19  ;;  %s197_s0 = smov [#allocation3]   ;;  %vm130_vm5 = vcmask 0  }
   0x5   :  { %v86_v13 = vand.u32 127, %v85_v10  ;;  %vm104_vm4 = vcmp.ge.s32.totalorder %v88_v4, 0  ;;  %s138_s1 = sshll.u32 %s197_s0, 4  ;;  %s139_s1 = int_to_ptr.vmem [resolvable:$true] %s138_s1 }
   0x6   :  { %67 = vmax.xlane.f32.xlu0 %v64_v3  ;;  %s171_s17 = scalar_lea.vmem %s139_s1, 16  ;;  %s175_s18 = scalar_lea.vmem %s139_s1, 32 }
   0x7   :  { %93 = vperm.xlu1 %161, %v88_v4   ;;  %p172_p0 = scmp.ne.s32.totalorder %s139_s1, %s171_s17  ;;  %p176_p1 = scmp.lt.s32.totalorder %s139_s1, %s139_s1 }
   0x8   :  { %p177_p2 = scmp.lt.s32.totalorder %s175_s18, %s171_s17 }
   0xa   :  { %p178_p3 = por %p177_p2, %p176_p1 }
   0xb   :  { %v105_v28 = vld [vmem:[#allocation2] sm:$0xff]  ;;  %v106_v34 = vld [vmem:[#allocation2 + $0x8] sm:$0xff] }
   0xc   :  { %p179_p4 = pnand %p178_p3, %p172_p0 }
  0x82   :  { %v91_v12 = vpop.permute.xlu1 %90 }
  0x83   :  { %vm95_vm0 = vcmp.eq.s32.totalorder %v86_v13, %v91_v12 }
  0x84   :  { %v97_v16 = vsel %vm95_vm0, %v63_v0, 0.0 }
  0x86   :  { %v94_v15 = vpop.permute.xlu1 %93 }
  0x87   :  { %vm96_vm1 = vcmp.eq.s32.totalorder %v86_v13, %v94_v15 }
  0x88   :  { %v98_v18 = vsel %vm96_vm1, %v64_v3, 0.0 }
  0x8f   :  { %v66_v5 = vpop.xlane.xlu0 %65 }
  0x90   :  { %v69_v6 = vsub.f32 %v63_v0, %v66_v5 }
  0x92   :  { %v71_v7 = vmul.f32 1.442695, %v69_v6 }
  0x93   :  { %v68_v8 = vpop.xlane.xlu0 %67 }
  0x94   :  { %163 = vpow2.f32 %v71_v7  ;;  %v70_v9 = vsub.f32 %v64_v3, %v68_v8 }
  0x96   :  { %v73_v11 = vmul.f32 1.442695, %v70_v9 }
  0x98   :  { %165 = vpow2.f32 %v73_v11 }
  0x9e   :  { %v164_v14 = vpop.eup %163 }
  0x9f   :  { %75 = vadd.xlane.f32.xlu0 %v164_v14 }
  0xa2   :  { %v166_v17 = vpop.eup %165 }
  0xa3   :  { %77 = vadd.xlane.f32.xlu1 %v166_v17  ;;  %99 = vadd.xlane.f32.xlu0 %v97_v16 }
  0xa7   :  { %101 = vadd.xlane.f32.xlu0 %v98_v18 }
 0x12c   :  { %v76_v20 = vpop.xlane.xlu0 %75 }
 0x12d   :  { %167 = vlog2.f32 %v76_v20 }
 0x130   :  { %v78_v21 = vpop.xlane.xlu1 %77  ;;  %v100_v24 = vpop.xlane.xlu0 %99 }
 0x131   :  { %169 = vlog2.f32 %v78_v21 }
 0x134   :  { %v102_v33 = vpop.xlane.xlu0 %101 }
 0x137   :  { %v168_v22 = vpop.eup %167 }
 0x138   :  { %v80_v23 = vmul.f32 0.6931472, %v168_v22 }
 0x13a   :  { %v83_v25 = vadd.f32 %v80_v23, %v66_v5 }
 0x13b   :  { %v170_v26 = vpop.eup %169 }
 0x13c   :  { %v82_v27 = vmul.f32 0.6931472, %v170_v26  ;;  %v107_v29 = vsub.f32 %v83_v25, %v100_v24 }
 0x13e   :  { %v109_v30 = vsel %vm103_vm3, %v107_v29, 0.0  ;;  %v84_v31 = vadd.f32 %v82_v27, %v68_v8 }
 0x13f   :  { %v111_v32 = vadd.f32 %v109_v30, %v105_v28 }
 0x140   :  { %v108_v35 = vsub.f32 %v84_v31, %v102_v33 }
 0x141   :  { %114 = vst.msk [vmem:[#allocation2] sm:$0xff] %vm60_vm2, %v111_v32 }
 0x142   :  { %v110_v36 = vsel %vm104_vm4, %v108_v35, 0.0 }
 0x143   :  { %v112_v37 = vadd.f32 %v110_v36, %v106_v34 }
 0x145   :  { %115 = vst.msk [vmem:[#allocation2 + $0x8] sm:$0xff] %vm60_vm2, %v112_v37 }
 0x148   :  { %v119_v38 = vld [vmem:[#allocation2] sm:$0xff] }
 0x149   :  { %v121_v40 = vsel %vm60_vm2, %v119_v38, 0.0 }
 0x14c   :  { %v120_v39 = vld [vmem:[#allocation2 + $0x8] sm:$0xff] }
 0x14d   :  { %v122_v41 = vsel %vm60_vm2, %v120_v39, 0.0 }
 0x14e   :  { %v123_v42 = vadd.f32 %v122_v41, %v121_v40 }
 0x150   :  { %v124_v43 = vrot.slane %v123_v42, 4 }
 0x152   :  { %v125_v44 = vadd.f32 %v124_v43, %v123_v42 }
 0x154   :  { %v126_v45 = vrot.slane %v125_v44, 2 }
 0x156   :  { %v127_v46 = vadd.f32 %v126_v45, %v125_v44 }
 0x158   :  { %v128_v47 = vrot.slane %v127_v46, 1 }
 0x15a   :  { %v129_v48 = vadd.f32 %v128_v47, %v127_v46 }
 0x15c   :  { %131 = vst.msk [vmem:[#allocation3] sm:$0x1] %vm130_vm5, %v129_v48 }
 0x15d   :  { %182 = shalt.err (!%p179_p4)
}
 0x15e   :  { %s183_s21 = scalar_lea.hbm %s245_s2, 16 }
 0x15f   :  { %p184_p5 = scmp.ne.s32.totalorder %s245_s2, %s183_s21  ;;  %p187_p6 = scmp.lt.u32.totalorder %s183_s21, %s245_s2 }
 0x161   :  { %p189_p7 = pnand %p187_p6, %p184_p5 }
 0x163   :  { %192 = shalt.err (!%p189_p7)
}
 0x164   :  { %141 = dma.vmem_to_hbm [thread:$0]  %s139_s1, 16, %s245_s2, [#allocation4]  }
 0x165   :  { %193 = dma.done.wait [#allocation4], 16  }
 0x166   :  { %194 = vsyncadd [#allocation4], 4294967280 }
 0x167   :  { %145 = vsyncpa [#allocation4], 1 }

</bundles_post_ra>
